<compile_context>
chip_gen: v7x
topology: tpu7x:2x2x1
jax: 0.10.0
libtpu: 0.0.40
codegen_flags: <defaults>
</compile_context>

<pallas_src>
import functools

import jax
import jax.numpy as jnp
from jax.experimental import pallas as pl
from jax.experimental.pallas import tpu as pltpu


_TARGET_TILE_BYTES = 3 * 1024 * 1024  # per in-flight buffer set (x, x_out, mu, sigma, mask)


def _plan_grid(h, d, z, x_itemsize, mu_itemsize, max_cores=2):
    """Pick (num_cores, num_tiles_per_core, tile_rows) over the half-batch axis."""
    # Bytes carried per half-batch row: both halves of x and x_output (2*D each),
    # both halves of mu and sigma (2*Z each), one mask element.
    row_bytes = 4 * d * x_itemsize + 4 * z * mu_itemsize + 4
    target = max(8, _TARGET_TILE_BYTES // max(row_bytes, 1))

    def best_tile(h_part):
        # Largest multiple-of-8 divisor of h_part that is <= target (layout-legal
        # sublane tiling), or None if there isn't one.
        t = (min(h_part, target) // 8) * 8
        while t >= 8:
            if h_part % t == 0:
                return t
            t -= 8
        return None

    num_cores = 1
    if max_cores >= 2 and h >= 256 and h % 16 == 0 and best_tile(h // 2) is not None:
        num_cores = 2  # worth sharding the half-batch across the two v7x TCs
    h_core = h // num_cores
    tile = best_tile(h_core)
    if tile is None:
        # No aligned tiling available (e.g. tiny/odd H): fall back to a single
        # full-extent block, which is always layout-legal (block dim == array dim).
        return 1, 1, h
    return num_cores, h_core // tile, tile


def _vae_loss_kernel(x_ref, xo_ref, mu_ref, sigma_ref, same_ref,
                     bce_ref, kld_ref, pair_ref, *, loss3_k):
    t = pl.program_id(1)

    # Per-core resident accumulators (output blocks indexed only by the core axis).
    @pl.when(t == 0)
    def _init():
        bce_ref[...] = jnp.zeros_like(bce_ref)
        kld_ref[...] = jnp.zeros_like(kld_ref)
        pair_ref[...] = jnp.zeros_like(pair_ref)

    # Upcast once; callers may stream bf16 to halve HBM bytes.
    x = x_ref[...].astype(jnp.float32)          # (2, TH, D)
    y = xo_ref[...].astype(jnp.float32)         # (2, TH, D)
    mu = mu_ref[...].astype(jnp.float32)        # (2, TH, Z)
    sigma = sigma_ref[...].astype(jnp.float32)  # (2, TH, Z)
    same = same_ref[...]                        # (TH, 1) f32, 1.0 where labels match

    # ---- loss1 partial: sum of x*log(y) + (1-x)*log(1-y) -------------------
    # Sign and the /(B*D) mean divisor are folded into the JAX epilogue.
    # Clamp log terms at -100 to match torch.nn.BCELoss.
    log_y = jnp.maximum(jnp.log(y), -100.0)
    log_1my = jnp.maximum(jnp.log(1.0 - y), -100.0)
    bce_ref[...] += jnp.reshape(jnp.sum(x * log_y + (1.0 - x) * log_1my), (1, 1, 1))

    # ---- loss2 partial: sum of (1 + 2*log2(sigma+eps) - mu^2 - sigma^2) ----
    # The -0.5 / B factor is applied in the epilogue.  log2 (not ln) reproduces
    # the reference module exactly.
    kld_terms = 1.0 + 2.0 * jnp.log2(sigma + 1e-5) - mu * mu - sigma * sigma
    kld_ref[...] += jnp.reshape(jnp.sum(kld_terms), (1, 1, 1))

    # ---- loss3 partial: contrastive pair loss -------------------------------
    # Both halves of each pair sit in the same tile (leading axis), so no
    # unaligned sublane slicing is needed.
    dmu = mu[0] - mu[1]                               # (TH, Z)
    dist = jnp.sum(dmu * dmu, axis=1, keepdims=True)  # (TH, 1)
    pair = jnp.where(same > 0.5, dist, jnp.maximum(loss3_k - dist, 0.0))
    pair_ref[...] += jnp.reshape(jnp.sum(pair), (1, 1, 1))


def vae_loss(x, x_mu, x_sigma, x_output, labels, batch_size,
             weight1=1.0, weight2=1.0, weight3=1.0, *,
             loss3_k=60.0, stream_dtype=None, max_cores=2):
    """Mirrors VAE_loss.forward. Returns (total, loss1, loss2, loss3) scalars."""
    b = int(batch_size)
    if b % 2 != 0:
        raise ValueError("VAE_loss pair term requires an even batch size.")
    h = b // 2

    x = jnp.reshape(x, (b, -1))
    x_output = jnp.reshape(x_output, (b, -1))
    x_mu = jnp.reshape(x_mu, (b, -1))
    x_sigma = jnp.reshape(x_sigma, (b, -1))
    d = x.shape[1]
    z = x_mu.shape[1]

    if stream_dtype is not None:
        # e.g. jnp.bfloat16: halves HBM traffic of the two big (B, D) streams;
        # the kernel upcasts and accumulates in f32 regardless.
        x = x.astype(stream_dtype)
        x_output = x_output.astype(stream_dtype)

    # Pair layout + host-side label mask (drops the int32 label stream).
    x3 = x.reshape(2, h, d)
    xo3 = x_output.reshape(2, h, d)
    mu3 = x_mu.reshape(2, h, z)
    sg3 = x_sigma.reshape(2, h, z)
    labels = jnp.reshape(labels, (b,))
    same = (labels[:h] == labels[h:]).astype(jnp.float32).reshape(h, 1)

    nc, nt, th = _plan_grid(h, d, z, x3.dtype.itemsize, mu3.dtype.itemsize, max_cores)

    tile_bytes = th * (4 * d * x3.dtype.itemsize + 4 * z * mu3.dtype.itemsize + 4)
    # Double-buffered inputs + elementwise intermediates, with a floor at the
    # v6e/v7x default and a ceiling below physical VMEM on every generation.
    vmem_limit = int(min(max(4 * tile_bytes + (8 << 20), 32 << 20), 56 << 20))

    kernel = functools.partial(_vae_loss_kernel, loss3_k=float(loss3_k))
    acc_shape = jax.ShapeDtypeStruct((nc, 1, 1), jnp.float32)

    def acc_spec():
        # Per-core scalar accumulator: resident across the reduction axis,
        # distinct block per parallel core.
        return pl.BlockSpec((1, 1, 1), lambda c, t: (c, 0, 0))

    bce_sum, kld_sum, pair_sum = pl.pallas_call(
        kernel,
        grid=(nc, nt),
        in_specs=[
            pl.BlockSpec((2, th, d), lambda c, t: (0, c * nt + t, 0)),
            pl.BlockSpec((2, th, d), lambda c, t: (0, c * nt + t, 0)),
            pl.BlockSpec((2, th, z), lambda c, t: (0, c * nt + t, 0)),
            pl.BlockSpec((2, th, z), lambda c, t: (0, c * nt + t, 0)),
            pl.BlockSpec((th, 1), lambda c, t: (c * nt + t, 0)),
        ],
        out_specs=(acc_spec(), acc_spec(), acc_spec()),
        out_shape=(acc_shape, acc_shape, acc_shape),
        compiler_params=pltpu.CompilerParams(
            dimension_semantics=("parallel", "arbitrary"),
            vmem_limit_bytes=vmem_limit,
        ),
    )(x3, xo3, mu3, sg3, same)

    # Scalar epilogue in JAX: mean divisors, signs and loss weights (free).
    loss1 = -jnp.sum(bce_sum) / float(b * d)
    loss2 = -0.5 * jnp.sum(kld_sum) / float(b)
    loss3 = jnp.sum(pair_sum) / float(h)
    total = weight1 * loss1 + weight2 * loss2 + weight3 * loss3
    return total, loss1, loss2, loss3


def _reference(x, x_mu, x_sigma, x_output, labels, batch_size, w1, w2, w3):
    """Pure-JAX reference mirroring the PyTorch module (for verification)."""
    xf = jnp.reshape(x, (batch_size, -1)).astype(jnp.float32)
    yf = jnp.reshape(x_output, (batch_size, -1)).astype(jnp.float32)
    log_y = jnp.maximum(jnp.log(yf), -100.0)
    log_1my = jnp.maximum(jnp.log(1.0 - yf), -100.0)
    loss1 = jnp.mean(-(xf * log_y + (1.0 - xf) * log_1my))
    kld = -0.5 * jnp.sum(1 + 2 * jnp.log2(x_sigma + 1e-5) - x_mu**2 - x_sigma**2, axis=1)
    loss2 = jnp.mean(kld)
    hb = batch_size // 2
    same = (labels[:hb] == labels[hb:]).astype(jnp.float32)
    dist = jnp.sum((x_mu[:hb] - x_mu[hb:]) ** 2, axis=1)
    loss3 = jnp.mean(jnp.where(same > 0.5, dist, jnp.maximum(60.0 - dist, 0.0)))
    return w1 * loss1 + w2 * loss2 + w3 * loss3, loss1, loss2, loss3


if __name__ == "__main__":
    def _run_case(key, b, dd, zz, w1, w2, w3):
        k1, k2, k3, k4, k5 = jax.random.split(key, 5)
        x = jax.random.uniform(k1, (b, dd), jnp.float32, minval=0.0, maxval=1.0)
        x_output = jax.random.uniform(k2, (b, dd), jnp.float32, minval=0.01, maxval=0.99)
        x_mu = jax.random.normal(k3, (b, zz), jnp.float32)
        x_sigma = 0.1 + jax.random.uniform(k4, (b, zz), jnp.float32)
        labels = jax.random.randint(k5, (b,), 0, 3, jnp.int32)

        out = jax.block_until_ready(
            vae_loss(x, x_mu, x_sigma, x_output, labels, b, w1, w2, w3))
        ref = _reference(x, x_mu, x_sigma, x_output, labels, b, w1, w2, w3)
        for got, want in zip(out, ref):
            g, w = float(got), float(want)
            assert abs(g - w) <= 1e-3 + 1e-3 * abs(w), (b, dd, zz, g, w)

    key = jax.random.PRNGKey(0)
    k_small, k_big = jax.random.split(key)
    # Small case (single full-extent block, one grid step).
    _run_case(k_small, 8, 256, 32, 1.0, 0.5, 0.25)
    # Larger case that exercises the pipelined grid: 2 core-shards x 2 tiles of
    # 64 pair-rows each, with resident per-core accumulators.
    _run_case(k_big, 512, 2048, 64, 1.0, 1.0, 1.0)
    print("KERNEL_OK")
</pallas_src>

<mosaic_0001>
module attributes {stable_mosaic.version = 11 : i64} {
  func.func @_vae_loss_kernel(%arg0: i32, %arg1: i32, %arg2: memref<2x4x256xf32, #tpu.memory_space<vmem>>, %arg3: memref<2x4x256xf32, #tpu.memory_space<vmem>>, %arg4: memref<2x4x32xf32, #tpu.memory_space<vmem>>, %arg5: memref<2x4x32xf32, #tpu.memory_space<vmem>>, %arg6: memref<4x1xf32, #tpu.memory_space<vmem>>, %arg7: memref<1x1x1xf32, #tpu.memory_space<vmem>>, %arg8: memref<1x1x1xf32, #tpu.memory_space<vmem>>, %arg9: memref<1x1x1xf32, #tpu.memory_space<vmem>>) attributes {dimension_semantics = [#tpu.dimension_semantics<parallel>, #tpu.dimension_semantics<arbitrary>], iteration_bounds = array<i64: 1, 1>, scalar_prefetch = 0 : i64, scratch_operands = 0 : i64, tpu.core_type = #tpu.core_type<tc>, window_params = [{transform_indices = @transform_0, window_bounds = array<i64: 2, 4, 256>}, {transform_indices = @transform_1, window_bounds = array<i64: 2, 4, 256>}, {transform_indices = @transform_2, window_bounds = array<i64: 2, 4, 32>}, {transform_indices = @transform_3, window_bounds = array<i64: 2, 4, 32>}, {transform_indices = @transform_4, window_bounds = array<i64: 4, 1>}, {transform_indices = @transform_5, window_bounds = array<i64: 1, 1, 1>}, {transform_indices = @transform_6, window_bounds = array<i64: 1, 1, 1>}, {transform_indices = @transform_7, window_bounds = array<i64: 1, 1, 1>}]} {
    %c0_i32 = arith.constant 0 : i32
    %0 = arith.cmpi eq, %arg1, %c0_i32 : i32
    %1 = arith.extui %0 : i1 to i32
    %c0_i32_0 = arith.constant 0 : i32
    %2 = arith.cmpi ne, %1, %c0_i32_0 : i32
    scf.if %2 {
      %cst_46 = arith.constant 0.000000e+00 : f32
      %74 = vector.broadcast %cst_46 : f32 to vector<1x1x1xf32>
      %c0_47 = arith.constant 0 : index
      %c0_48 = arith.constant 0 : index
      %c0_49 = arith.constant 0 : index
      %75 = vector.load %arg7[%c0_47, %c0_48, %c0_49] : memref<1x1x1xf32, #tpu.memory_space<vmem>>, vector<1x1x1xf32>
      tpu.vector_store %arg7[%c0_47, %c0_48, %c0_49], %74 {strides = array<i32>} : memref<1x1x1xf32, #tpu.memory_space<vmem>>, vector<1x1x1xf32>,
      %cst_50 = arith.constant 0.000000e+00 : f32
      %76 = vector.broadcast %cst_50 : f32 to vector<1x1x1xf32>
      %c0_51 = arith.constant 0 : index
      %c0_52 = arith.constant 0 : index
      %c0_53 = arith.constant 0 : index
      %77 = vector.load %arg8[%c0_51, %c0_52, %c0_53] : memref<1x1x1xf32, #tpu.memory_space<vmem>>, vector<1x1x1xf32>
      tpu.vector_store %arg8[%c0_51, %c0_52, %c0_53], %76 {strides = array<i32>} : memref<1x1x1xf32, #tpu.memory_space<vmem>>, vector<1x1x1xf32>,
      %cst_54 = arith.constant 0.000000e+00 : f32
      %78 = vector.broadcast %cst_54 : f32 to vector<1x1x1xf32>
      %c0_55 = arith.constant 0 : index
      %c0_56 = arith.constant 0 : index
      %c0_57 = arith.constant 0 : index
      %79 = vector.load %arg9[%c0_55, %c0_56, %c0_57] : memref<1x1x1xf32, #tpu.memory_space<vmem>>, vector<1x1x1xf32>
      tpu.vector_store %arg9[%c0_55, %c0_56, %c0_57], %78 {strides = array<i32>} : memref<1x1x1xf32, #tpu.memory_space<vmem>>, vector<1x1x1xf32>,
    } else {
    }
    %c0 = arith.constant 0 : index
    %c0_1 = arith.constant 0 : index
    %c0_2 = arith.constant 0 : index
    %3 = vector.load %arg2[%c0, %c0_1, %c0_2] : memref<2x4x256xf32, #tpu.memory_space<vmem>>, vector<2x4x256xf32>
    %c0_3 = arith.constant 0 : index
    %c0_4 = arith.constant 0 : index
    %c0_5 = arith.constant 0 : index
    %4 = vector.load %arg3[%c0_3, %c0_4, %c0_5] : memref<2x4x256xf32, #tpu.memory_space<vmem>>, vector<2x4x256xf32>
    %c0_6 = arith.constant 0 : index
    %c0_7 = arith.constant 0 : index
    %c0_8 = arith.constant 0 : index
    %5 = vector.load %arg4[%c0_6, %c0_7, %c0_8] : memref<2x4x32xf32, #tpu.memory_space<vmem>>, vector<2x4x32xf32>
    %c0_9 = arith.constant 0 : index
    %c0_10 = arith.constant 0 : index
    %c0_11 = arith.constant 0 : index
    %6 = vector.load %arg5[%c0_9, %c0_10, %c0_11] : memref<2x4x32xf32, #tpu.memory_space<vmem>>, vector<2x4x32xf32>
    %c0_12 = arith.constant 0 : index
    %c0_13 = arith.constant 0 : index
    %7 = vector.load %arg6[%c0_12, %c0_13] : memref<4x1xf32, #tpu.memory_space<vmem>>, vector<4x1xf32>
    %8 = math.log %4 : vector<2x4x256xf32>
    %cst = arith.constant -1.000000e+02 : f32
    %9 = vector.broadcast %cst : f32 to vector<2x4x256xf32>
    %10 = arith.maximumf %8, %9 : vector<2x4x256xf32>
    %cst_14 = arith.constant 1.000000e+00 : f32
    %11 = vector.broadcast %cst_14 : f32 to vector<2x4x256xf32>
    %12 = arith.subf %11, %4 : vector<2x4x256xf32>
    %13 = math.log %12 : vector<2x4x256xf32>
    %cst_15 = arith.constant -1.000000e+02 : f32
    %14 = vector.broadcast %cst_15 : f32 to vector<2x4x256xf32>
    %15 = arith.maximumf %13, %14 : vector<2x4x256xf32>
    %c0_16 = arith.constant 0 : index
    %c0_17 = arith.constant 0 : index
    %c0_18 = arith.constant 0 : index
    %16 = vector.load %arg7[%c0_16, %c0_17, %c0_18] : memref<1x1x1xf32, #tpu.memory_space<vmem>>, vector<1x1x1xf32>
    %17 = arith.mulf %3, %10 : vector<2x4x256xf32>
    %cst_19 = arith.constant 1.000000e+00 : f32
    %18 = vector.broadcast %cst_19 : f32 to vector<2x4x256xf32>
    %19 = arith.subf %18, %3 : vector<2x4x256xf32>
    %20 = arith.mulf %19, %15 : vector<2x4x256xf32>
    %21 = arith.addf %17, %20 : vector<2x4x256xf32>
    %22 = vector.shape_cast %21 : vector<2x4x256xf32> to vector<1x2x4x256xf32>
    %cst_20 = arith.constant dense<0.000000e+00> : vector<1xf32>
    %23 = vector.multi_reduction <add>, %22, %cst_20 [1, 2, 3] : vector<1x2x4x256xf32> to vector<1xf32>
    %24 = vector.shape_cast %23 : vector<1xf32> to vector<1x1x1x1xf32>
    %25 = vector.extract %24[0, 0, 0, 0] : f32 from vector<1x1x1x1xf32>
    %26 = vector.broadcast %25 : f32 to vector<1x1x1xf32>
    %27 = arith.addf %16, %26 : vector<1x1x1xf32>
    %c0_21 = arith.constant 0 : index
    %c0_22 = arith.constant 0 : index
    %c0_23 = arith.constant 0 : index
    %28 = vector.load %arg7[%c0_21, %c0_22, %c0_23] : memref<1x1x1xf32, #tpu.memory_space<vmem>>, vector<1x1x1xf32>
    tpu.vector_store %arg7[%c0_21, %c0_22, %c0_23], %27 {strides = array<i32>} : memref<1x1x1xf32, #tpu.memory_space<vmem>>, vector<1x1x1xf32>,
    %cst_24 = arith.constant 9.99999974E-6 : f32
    %29 = vector.broadcast %cst_24 : f32 to vector<2x4x32xf32>
    %30 = arith.addf %6, %29 : vector<2x4x32xf32>
    %31 = math.log %30 : vector<2x4x32xf32>
    %cst_25 = arith.constant 2.000000e+00 : f32
    %32 = math.log %cst_25 : f32
    %33 = vector.broadcast %32 : f32 to vector<2x4x32xf32>
    %34 = arith.divf %31, %33 : vector<2x4x32xf32>
    %cst_26 = arith.constant 2.000000e+00 : f32
    %35 = vector.broadcast %cst_26 : f32 to vector<2x4x32xf32>
    %36 = arith.mulf %35, %34 : vector<2x4x32xf32>
    %cst_27 = arith.constant 1.000000e+00 : f32
    %37 = vector.broadcast %cst_27 : f32 to vector<2x4x32xf32>
    %38 = arith.addf %37, %36 : vector<2x4x32xf32>
    %39 = arith.mulf %5, %5 : vector<2x4x32xf32>
    %40 = arith.subf %38, %39 : vector<2x4x32xf32>
    %41 = arith.mulf %6, %6 : vector<2x4x32xf32>
    %42 = arith.subf %40, %41 : vector<2x4x32xf32>
    %c0_28 = arith.constant 0 : index
    %c0_29 = arith.constant 0 : index
    %c0_30 = arith.constant 0 : index
    %43 = vector.load %arg8[%c0_28, %c0_29, %c0_30] : memref<1x1x1xf32, #tpu.memory_space<vmem>>, vector<1x1x1xf32>
    %44 = vector.shape_cast %42 : vector<2x4x32xf32> to vector<1x2x4x32xf32>
    %cst_31 = arith.constant dense<0.000000e+00> : vector<1xf32>
    %45 = vector.multi_reduction <add>, %44, %cst_31 [1, 2, 3] : vector<1x2x4x32xf32> to vector<1xf32>
    %46 = vector.shape_cast %45 : vector<1xf32> to vector<1x1x1x1xf32>
    %47 = vector.extract %46[0, 0, 0, 0] : f32 from vector<1x1x1x1xf32>
    %48 = vector.broadcast %47 : f32 to vector<1x1x1xf32>
    %49 = arith.addf %43, %48 : vector<1x1x1xf32>
    %c0_32 = arith.constant 0 : index
    %c0_33 = arith.constant 0 : index
    %c0_34 = arith.constant 0 : index
    %50 = vector.load %arg8[%c0_32, %c0_33, %c0_34] : memref<1x1x1xf32, #tpu.memory_space<vmem>>, vector<1x1x1xf32>
    tpu.vector_store %arg8[%c0_32, %c0_33, %c0_34], %49 {strides = array<i32>} : memref<1x1x1xf32, #tpu.memory_space<vmem>>, vector<1x1x1xf32>,
    %51 = vector.extract_strided_slice %5 {offsets = [0, 0, 0], sizes = [1, 4, 32], strides = [1, 1, 1]} : vector<2x4x32xf32> to vector<1x4x32xf32>
    %52 = vector.shape_cast %51 : vector<1x4x32xf32> to vector<4x32xf32>
    %53 = vector.extract_strided_slice %5 {offsets = [1, 0, 0], sizes = [1, 4, 32], strides = [1, 1, 1]} : vector<2x4x32xf32> to vector<1x4x32xf32>
    %54 = vector.shape_cast %53 : vector<1x4x32xf32> to vector<4x32xf32>
    %55 = arith.subf %52, %54 : vector<4x32xf32>
    %56 = arith.mulf %55, %55 : vector<4x32xf32>
    %cst_35 = arith.constant dense<0.000000e+00> : vector<4xf32>
    %57 = vector.multi_reduction <add>, %56, %cst_35 [1] : vector<4x32xf32> to vector<4xf32>
    %58 = vector.shape_cast %57 : vector<4xf32> to vector<4x1xf32>
    %cst_36 = arith.constant 5.000000e-01 : f32
    %59 = vector.broadcast %cst_36 : f32 to vector<4x1xf32>
    %60 = arith.cmpf ogt, %7, %59 : vector<4x1xf32>
    %cst_37 = arith.constant 6.000000e+01 : f32
    %61 = vector.broadcast %cst_37 : f32 to vector<4x1xf32>
    %62 = arith.subf %61, %58 : vector<4x1xf32>
    %cst_38 = arith.constant 0.000000e+00 : f32
    %63 = vector.broadcast %cst_38 : f32 to vector<4x1xf32>
    %64 = arith.maximumf %62, %63 : vector<4x1xf32>
    %65 = arith.select %60, %58, %64 : vector<4x1xi1>, vector<4x1xf32>
    %c0_39 = arith.constant 0 : index
    %c0_40 = arith.constant 0 : index
    %c0_41 = arith.constant 0 : index
    %66 = vector.load %arg9[%c0_39, %c0_40, %c0_41] : memref<1x1x1xf32, #tpu.memory_space<vmem>>, vector<1x1x1xf32>
    %67 = vector.shape_cast %65 : vector<4x1xf32> to vector<1x4x1xf32>
    %cst_42 = arith.constant dense<0.000000e+00> : vector<1xf32>
    %68 = vector.multi_reduction <add>, %67, %cst_42 [1, 2] : vector<1x4x1xf32> to vector<1xf32>
    %69 = vector.shape_cast %68 : vector<1xf32> to vector<1x1x1xf32>
    %70 = vector.extract %69[0, 0, 0] : f32 from vector<1x1x1xf32>
    %71 = vector.broadcast %70 : f32 to vector<1x1x1xf32>
    %72 = arith.addf %66, %71 : vector<1x1x1xf32>
    %c0_43 = arith.constant 0 : index
    %c0_44 = arith.constant 0 : index
    %c0_45 = arith.constant 0 : index
    %73 = vector.load %arg9[%c0_43, %c0_44, %c0_45] : memref<1x1x1xf32, #tpu.memory_space<vmem>>, vector<1x1x1xf32>
    tpu.vector_store %arg9[%c0_43, %c0_44, %c0_45], %72 {strides = array<i32>} : memref<1x1x1xf32, #tpu.memory_space<vmem>>, vector<1x1x1xf32>,
    return
  }
  func.func @transform_0(%arg0: i32, %arg1: i32) -> (i32, i32, i32) {
    %c1_i32 = arith.constant 1 : i32
    %0 = arith.muli %arg0, %c1_i32 : i32
    %1 = arith.addi %0, %arg1 : i32
    %c0_i32 = arith.constant 0 : i32
    %c0_i32_0 = arith.constant 0 : i32
    %c0_i32_1 = arith.constant 0 : i32
    return %c0_i32, %1, %c0_i32_0 : i32, i32, i32
  }
  func.func @transform_1(%arg0: i32, %arg1: i32) -> (i32, i32, i32) {
    %c1_i32 = arith.constant 1 : i32
    %0 = arith.muli %arg0, %c1_i32 : i32
    %1 = arith.addi %0, %arg1 : i32
    %c0_i32 = arith.constant 0 : i32
    %c0_i32_0 = arith.constant 0 : i32
    %c0_i32_1 = arith.constant 0 : i32
    return %c0_i32, %1, %c0_i32_0 : i32, i32, i32
  }
  func.func @transform_2(%arg0: i32, %arg1: i32) -> (i32, i32, i32) {
    %c1_i32 = arith.constant 1 : i32
    %0 = arith.muli %arg0, %c1_i32 : i32
    %1 = arith.addi %0, %arg1 : i32
    %c0_i32 = arith.constant 0 : i32
    %c0_i32_0 = arith.constant 0 : i32
    %c0_i32_1 = arith.constant 0 : i32
    return %c0_i32, %1, %c0_i32_0 : i32, i32, i32
  }
  func.func @transform_3(%arg0: i32, %arg1: i32) -> (i32, i32, i32) {
    %c1_i32 = arith.constant 1 : i32
    %0 = arith.muli %arg0, %c1_i32 : i32
    %1 = arith.addi %0, %arg1 : i32
    %c0_i32 = arith.constant 0 : i32
    %c0_i32_0 = arith.constant 0 : i32
    %c0_i32_1 = arith.constant 0 : i32
    return %c0_i32, %1, %c0_i32_0 : i32, i32, i32
  }
  func.func @transform_4(%arg0: i32, %arg1: i32) -> (i32, i32) {
    %c1_i32 = arith.constant 1 : i32
    %0 = arith.muli %arg0, %c1_i32 : i32
    %1 = arith.addi %0, %arg1 : i32
    %c0_i32 = arith.constant 0 : i32
    %c0_i32_0 = arith.constant 0 : i32
    return %1, %c0_i32 : i32, i32
  }
  func.func @transform_5(%arg0: i32, %arg1: i32) -> (i32, i32, i32) {
    %c0_i32 = arith.constant 0 : i32
    %c0_i32_0 = arith.constant 0 : i32
    %c0_i32_1 = arith.constant 0 : i32
    return %arg0, %c0_i32, %c0_i32_0 : i32, i32, i32
  }
  func.func @transform_6(%arg0: i32, %arg1: i32) -> (i32, i32, i32) {
    %c0_i32 = arith.constant 0 : i32
    %c0_i32_0 = arith.constant 0 : i32
    %c0_i32_1 = arith.constant 0 : i32
    return %arg0, %c0_i32, %c0_i32_0 : i32, i32, i32
  }
  func.func @transform_7(%arg0: i32, %arg1: i32) -> (i32, i32, i32) {
    %c0_i32 = arith.constant 0 : i32
    %c0_i32_0 = arith.constant 0 : i32
    %c0_i32_1 = arith.constant 0 : i32
    return %arg0, %c0_i32, %c0_i32_0 : i32, i32, i32
  }
}

</mosaic_0001>

<bundles_post_ra>
// kernel: tpu_custom_call.1
= control target key start
LH: loop header
LB: loop body
LE: loop exit
PB: predicated region body
PF: predicated region fallthrough
CT: control target
= control target key end

     0   :  { %13 = vsyncpa [#allocation3], 0  ;;  %s588_s0 = inlined_call_operand.hbm [shape: f32[2,4,256], index: 0, kind: input, shape index: {}]   ;;  %s589_s1 = inlined_call_operand.hbm [shape: f32[2,4,256], index: 1, kind: input, shape index: {}]   ;;  %s590_s2 = inlined_call_operand.vmem [shape: f32[2,4,32], index: 2, kind: input, shape index: {}]   ;;  %s591_s3 = inlined_call_operand.vmem [shape: f32[2,4,32], index: 3, kind: input, shape index: {}]   ;;  %s592_s4 = inlined_call_operand.vmem [shape: f32[4,1], index: 4, kind: input, shape index: {}]   ;;  %s593_s5 = inlined_call_operand.hbm [shape: f32[1,1,1], index: 5, kind: output, shape index: {0}]   ;;  %s594_s6 = inlined_call_operand.hbm [shape: f32[1,1,1], index: 6, kind: output, shape index: {1}]   ;;  %s595_s7 = inlined_call_operand.hbm [shape: f32[1,1,1], index: 7, kind: output, shape index: {2}]  }
   0x1   :  { %14 = vsyncpa [#allocation6], 0 }
   0x2   :  { %15 = vsyncpa [#allocation4], 0 }
   0x3   :  { %16 = vsyncpa [#allocation9], 0  ;;  %s448_s24 = smov [#allocation2]   ;;  %s330_s28 = scalar_lea.hbm %s588_s0, 256 }
   0x4   :  { %s26_s25 = sshll.u32 %s448_s24, 4  ;;  %p331_p0 = scmp.ne.s32.totalorder %s588_s0, %s330_s28  ;;  %s27_s25 = int_to_ptr.vmem [resolvable:$true] %s26_s25 }
   0x5   :  { %p334_p1 = scmp.lt.u32.totalorder %s330_s28, %s588_s0 }
   0x7   :  { %p336_p2 = pnand %p334_p1, %p331_p0 }
   0x9   :  { %339 = shalt.err (!%p336_p2)
}
   0xa   :  { %s340_s10 = scalar_lea.vmem %s27_s25, 256  ;;  %p345_p4 = scmp.lt.s32.totalorder %s27_s25, %s27_s25 }
   0xb   :  { %p341_p3 = scmp.ne.s32.totalorder %s27_s25, %s340_s10  ;;  %p346_p5 = scmp.lt.s32.totalorder %s340_s10, %s340_s10 }
   0xd   :  { %p347_p6 = por %p346_p5, %p345_p4 }
   0xf   :  { %p348_p7 = pnand %p347_p6, %p341_p3 }
  0x11   :  { %351 = shalt.err (!%p348_p7)
}
  0x12   :  { %s449_s11 = smov 128   ;;  %s450_s12 = smov 8  }
  0x13   :  { %32 = dma.hbm_to_vmem [thread:$0]  %s588_s0, 256, %s27_s25, [#allocation3], %s449_s11, %s449_s11, %s450_s12  }
  0x14   :  { %s451_s15 = smov [#allocation5]   ;;  %s352_s19 = scalar_lea.hbm %s589_s1, 256 }
  0x15   :  { %s42_s16 = sshll.u32 %s451_s15, 4  ;;  %p353_p8 = scmp.ne.s32.totalorder %s589_s1, %s352_s19  ;;  %s43_s16 = int_to_ptr.vmem [resolvable:$true] %s42_s16 }
  0x16   :  { %p356_p9 = scmp.lt.u32.totalorder %s352_s19, %s589_s1 }
  0x18   :  { %p358_p10 = pnand %p356_p9, %p353_p8 }
  0x1a   :  { %361 = shalt.err (!%p358_p10)
}
  0x1b   :  { %s362_s24 = scalar_lea.vmem %s43_s16, 256  ;;  %p367_p12 = scmp.lt.s32.totalorder %s43_s16, %s43_s16 }
  0x1c   :  { %p363_p11 = scmp.ne.s32.totalorder %s43_s16, %s362_s24  ;;  %p368_p13 = scmp.lt.s32.totalorder %s362_s24, %s362_s24 }
  0x1e   :  { %p369_p0 = por %p368_p13, %p367_p12 }
  0x20   :  { %p370_p1 = pnand %p369_p0, %p363_p11 }
  0x22   :  { %373 = shalt.err (!%p370_p1)
}
  0x23   :  { %48 = dma.hbm_to_vmem [thread:$0]  %s589_s1, 256, %s43_s16, [#allocation6], %s449_s11, %s449_s11, %s450_s12  }
  0x24   :  { %440 = dma.done.wait [#allocation3], 256  }
  0x25   :  { %441 = vsyncadd [#allocation3], 4294967040 }
  0x26   :  { %442 = dma.done.wait [#allocation6], 256  }
  0x27   :  { %443 = vsyncadd [#allocation6], 4294967040  ;;  %v126_v0 = vld [vmem:[%s590_s2] sm:$0xf]  ;;  %v127_v1 = vld [vmem:[%s590_s2 + $0x4] sm:$0xf] }
  0x28   :  { %v128_v2 = vld [vmem:[%s591_s3] sm:$0xf]  ;;  %v219_v3 = vsub.f32 %v126_v0, %v127_v1  ;;  %v129_v4 = vld [vmem:[%s591_s3 + $0x4] sm:$0xf]  ;;  %vm203_vm0 = vcmask 257024   ;;  %v124_v7 = vld [vmem:[#allocation5] sm:$0xff]  ;;  %v195_v24 = vmul.f32 %v127_v1, %v127_v1  ;;  %v194_v25 = vmul.f32 %v126_v0, %v126_v0 }
  0x29   :  { %v181_v5 = vadd.f32 1e-05, %v128_v2  ;;  %v182_v6 = vadd.f32 1e-05, %v129_v4  ;;  %v125_v8 = vld [vmem:[#allocation5 + $0x8] sm:$0xff]  ;;  %v137_v10 = vsub.f32 1.0, %v124_v7  ;;  %v198_v38 = vmul.f32 %v128_v2, %v128_v2 }
  0x2a   :  { %v220_v9 = vmul.f32 %v219_v3, %v219_v3  ;;  %v138_v11 = vsub.f32 1.0, %v125_v8  ;;  %v122_v18 = vld [vmem:[#allocation2] sm:$0xff]  ;;  %v123_v21 = vld [vmem:[#allocation2 + $0x8] sm:$0xff]  ;;  %v199_v42 = vmul.f32 %v129_v4, %v129_v4  ;;  %vm160_vm1 = vcmask 1043456   ;;  %s453_s3 = smov [#allocation7]   ;;  %s454_s12 = smov [#allocation8]  }
  0x2b   :  { %318 = vlog2.f32 %v181_v5  ;;  %v148_v32 = vsub.f32 1.0, %v122_v18  ;;  %v149_v36 = vsub.f32 1.0, %v123_v21  ;;  %v130_v1 = vld [vmem:[%s592_s4] sm:$0xf]  ;;  %vm229_vm3 = vcmask 3072   ;;  %s249_s4 = sshll.u32 %s453_s3, 4  ;;  %s250_s4 = int_to_ptr.vmem [resolvable:$true] %s249_s4 }
  0x2c   :  { %320 = vlog2.f32 %v182_v6  ;;  %v221_v12 = vsel %vm203_vm0, %v220_v9, 0.0  ;;  %vm224_vm2 = vcmp.gt.f32.partialorder %v130_v1, 0.5  ;;  %vm118_vm4 = vcmask 0   ;;  %s259_s13 = sshll.u32 %s454_s12, 4  ;;  %s374_s15 = scalar_lea.vmem %s250_s4, 16  ;;  %s541_s13 = int_to_ptr.vmem [resolvable:$true] %s259_s13 }
  0x2d   :  { %322 = vlog2.f32 %v124_v7  ;;  %222 = vadd.xlane.f32.xlu0 %v221_v12  ;;  %p375_p2 = scmp.ne.s32.totalorder %s250_s4, %s374_s15  ;;  %s378_s16 = scalar_lea.vmem %s250_s4, 32 }
  0x2e   :  { %324 = vlog2.f32 %v125_v8  ;;  %p379_p3 = scmp.lt.s32.totalorder %s250_s4, %s250_s4  ;;  %p380_p4 = scmp.lt.s32.totalorder %s378_s16, %s374_s15 }
  0x2f   :  { %326 = vlog2.f32 %v137_v10 }
  0x30   :  { %328 = vlog2.f32 %v138_v11  ;;  %p381_p5 = por %p380_p4, %p379_p3 }
  0x32   :  { %p382_p6 = pnand %p381_p5, %p375_p2 }
  0x35   :  { %v319_v13 = vpop.eup %318 }
  0x36   :  { %v321_v14 = vpop.eup %320  ;;  %v184_v15 = vmul.f32 0.6931472, %v319_v13 }
  0x37   :  { %v323_v16 = vpop.eup %322  ;;  %v186_v17 = vmul.f32 0.6931472, %v321_v14 }
  0x38   :  { %v325_v19 = vpop.eup %324  ;;  %v188_v20 = vmul.f32 1.442695, %v184_v15  ;;  %v132_v22 = vmul.f32 0.6931472, %v323_v16  ;;  %v452_v16 = vmov 0.0  }
  0x39   :  { %v327_v23 = vpop.eup %326  ;;  %v189_v26 = vmul.f32 1.442695, %v186_v17  ;;  %v134_v27 = vmul.f32 0.6931472, %v325_v19  ;;  %119 = vst.msk [vmem:[#allocation7] sm:$0x1] %vm118_vm4, %v452_v16 }
  0x3a   :  { %v329_v28 = vpop.eup %328  ;;  %v190_v29 = vmul.f32 2.0, %v188_v20  ;;  %v135_v30 = vmax.f32 %v132_v22, -100.0  ;;  %v140_v31 = vmul.f32 0.6931472, %v327_v23  ;;  %120 = vst.msk [vmem:[#allocation8] sm:$0x1] %vm118_vm4, %v452_v16 }
  0x3b   :  { %v191_v33 = vmul.f32 2.0, %v189_v26  ;;  %v136_v34 = vmax.f32 %v134_v27, -100.0  ;;  %v142_v35 = vmul.f32 0.6931472, %v329_v28  ;;  %121 = vst.msk [vmem:[#allocation10] sm:$0x1] %vm118_vm4, %v452_v16 }
  0x3c   :  { %v192_v37 = vadd.f32 1.0, %v190_v29  ;;  %v143_v39 = vmax.f32 %v140_v31, -100.0  ;;  %v146_v40 = vmul.f32 %v135_v30, %v122_v18 }
  0x3d   :  { %v193_v41 = vadd.f32 1.0, %v191_v33  ;;  %v144_v43 = vmax.f32 %v142_v35, -100.0  ;;  %v147_v44 = vmul.f32 %v136_v34, %v123_v21 }
  0x3e   :  { %v196_v45 = vsub.f32 %v192_v37, %v194_v25  ;;  %v150_v46 = vmul.f32 %v148_v32, %v143_v39 }
  0x3f   :  { %v197_v47 = vsub.f32 %v193_v41, %v195_v24  ;;  %v151_v48 = vmul.f32 %v149_v36, %v144_v43 }
  0x40   :  { %v200_v49 = vsub.f32 %v196_v45, %v198_v38  ;;  %v152_v50 = vadd.f32 %v150_v46, %v146_v40  ;;  %v145_v22 = vld [vmem:[#allocation7] sm:$0x1] }
  0x41   :  { %v201_v51 = vsub.f32 %v197_v47, %v199_v42  ;;  %v153_v52 = vadd.f32 %v151_v48, %v147_v44  ;;  %v202_v23 = vld [vmem:[#allocation8] sm:$0x1] }
  0x42   :  { %v204_v53 = vsel %vm203_vm0, %v200_v49, 0.0  ;;  %v156_v54 = vcombine.high %v152_v50, %v152_v50  ;;  %v161_v55 = vsel %vm160_vm1, %v152_v50, 0.0 }
  0x43   :  { %v205_v56 = vsel %vm203_vm0, %v201_v51, 0.0  ;;  %v157_v57 = vcombine.high %v153_v52, %v153_v52  ;;  %v164_v60 = vsel %vm160_vm1, %v153_v52, 0.0 }
  0x44   :  { %v206_v58 = vadd.f32 %v205_v56, %v204_v53  ;;  %v162_v59 = vsel %vm160_vm1, %v156_v54, 0.0 }
  0x45   :  { %v163_v61 = vadd.f32 %v162_v59, %v161_v55  ;;  %v166_v62 = vsel %vm160_vm1, %v157_v57, 0.0 }
  0x46   :  { %207 = vadd.xlane.f32.xlu1 %v206_v58 }
  0x47   :  { %v165_v63 = vadd.f32 %v164_v60, %v163_v61 }
  0x49   :  { %v167_v0 = vadd.f32 %v166_v62, %v165_v63 }
  0x4b   :  { %168 = vadd.xlane.f32.xlu0 %v167_v0 }
  0xba   :  { %v223_v2 = vpop.xlane.xlu0 %222 }
  0xbb   :  { %v225_v3 = vsub.f32 60.0, %v223_v2 }
  0xbd   :  { %v226_v4 = vmax.f32 %v225_v3, 0.0 }
  0xbf   :  { %v227_v5 = vsel %vm224_vm2, %v223_v2, %v226_v4 }
  0xc0   :  { %v230_v6 = vsel %vm229_vm3, %v227_v5, 0.0 }
  0xc1   :  { %231 = vadd.xlane.f32.xlu1 %v230_v6 }
  0xd3   :  { %v208_v7 = vpop.xlane.xlu1 %207 }
  0xd4   :  { %v209_v8 = vrot.slane %v208_v7, 4 }
  0xd6   :  { %v210_v9 = vadd.f32 %v209_v8, %v208_v7 }
  0xd8   :  { %v211_v10 = vrot.slane %v210_v9, 2  ;;  %v169_v11 = vpop.xlane.xlu0 %168 }
  0xd9   :  { %v170_v12 = vrot.slane %v169_v11, 4 }
  0xda   :  { %v212_v13 = vadd.f32 %v211_v10, %v210_v9 }
  0xdb   :  { %v171_v14 = vadd.f32 %v170_v12, %v169_v11 }
  0xdc   :  { %v213_v17 = vrot.slane %v212_v13, 1 }
  0xdd   :  { %v172_v15 = vrot.slane %v171_v14, 2 }
  0xde   :  { %v214_v20 = vadd.f32 %v213_v17, %v212_v13 }
  0xdf   :  { %v173_v18 = vadd.f32 %v172_v15, %v171_v14 }
  0xe1   :  { %v174_v19 = vrot.slane %v173_v18, 1 }
  0xe3   :  { %v175_v21 = vadd.f32 %v174_v19, %v173_v18 }
  0xe5   :  { %304 = vpush %v175_v21 }
  0xe6   :  { %306 = vpush %v214_v20 }
 0x116   :  { %s305_s11 = spop %304 }
 0x117   :  { %v177_v24 = vstv %s305_s11  ;;  %s307_s14 = spop %306 }
 0x118   :  { %v178_v25 = vadd.f32 %v177_v24, %v145_v22  ;;  %v216_v26 = vstv %s307_s14 }
 0x119   :  { %v217_v27 = vadd.f32 %v216_v26, %v202_v23 }
 0x11a   :  { %180 = vst.msk [vmem:[#allocation7] sm:$0x1] %vm118_vm4, %v178_v25 }
 0x11b   :  { %218 = vst.msk [vmem:[#allocation8] sm:$0x1] %vm118_vm4, %v217_v27 }
 0x11c   :  { %385 = shalt.err (!%p382_p6)
}
 0x11d   :  { %s386_s19 = scalar_lea.hbm %s593_s5, 16 }
 0x11e   :  { %p387_p7 = scmp.ne.s32.totalorder %s593_s5, %s386_s19  ;;  %p390_p8 = scmp.lt.u32.totalorder %s386_s19, %s593_s5 }
 0x120   :  { %p392_p9 = pnand %p390_p8, %p387_p7 }
 0x122   :  { %395 = shalt.err (!%p392_p9)
}
 0x123   :  { %252 = dma.vmem_to_hbm [thread:$0]  %s250_s4, 16, %s593_s5, [#allocation4]  }
 0x124   :  { %s396_s25 = scalar_lea.vmem %s541_s13, 16  ;;  %s400_s26 = scalar_lea.vmem %s541_s13, 32 }
 0x125   :  { %p397_p10 = scmp.ne.s32.totalorder %s541_s13, %s396_s25  ;;  %p401_p11 = scmp.lt.s32.totalorder %s541_s13, %s541_s13 }
 0x126   :  { %p402_p12 = scmp.lt.s32.totalorder %s400_s26, %s396_s25 }
 0x128   :  { %p403_p13 = por %p402_p12, %p401_p11 }
 0x12a   :  { %p404_p0 = pnand %p403_p13, %p397_p10 }
 0x12c   :  { %407 = shalt.err (!%p404_p0)
}
 0x12d   :  { %s408_s29 = scalar_lea.hbm %s594_s6, 16 }
 0x12e   :  { %p409_p1 = scmp.ne.s32.totalorder %s594_s6, %s408_s29  ;;  %p412_p2 = scmp.lt.u32.totalorder %s408_s29, %s594_s6 }
 0x130   :  { %p414_p3 = pnand %p412_p2, %p409_p1 }
 0x132   :  { %417 = shalt.err (!%p414_p3)
}
 0x133   :  { %262 = dma.vmem_to_hbm [thread:$0]  %s541_s13, 16, %s594_s6, [#allocation9]   ;;  %v228_v35 = vld [vmem:[#allocation10] sm:$0x1] }
 0x134   :  { %s455_s2 = smov [#allocation10]  }
 0x135   :  { %s269_s3 = sshll.u32 %s455_s2, 4  ;;  %s270_s3 = int_to_ptr.vmem [resolvable:$true] %s269_s3 }
 0x136   :  { %s418_s11 = scalar_lea.vmem %s270_s3, 16  ;;  %s422_s6 = scalar_lea.vmem %s270_s3, 32 }
 0x137   :  { %p419_p4 = scmp.ne.s32.totalorder %s270_s3, %s418_s11  ;;  %p423_p5 = scmp.lt.s32.totalorder %s270_s3, %s270_s3 }
 0x138   :  { %p424_p6 = scmp.lt.s32.totalorder %s422_s6, %s418_s11 }
 0x13a   :  { %p425_p7 = por %p424_p6, %p423_p5 }
 0x13c   :  { %p426_p8 = pnand %p425_p7, %p419_p4 }
 0x14e   :  { %v232_v28 = vpop.xlane.xlu1 %231 }
 0x14f   :  { %v233_v29 = vrot.slane %v232_v28, 4 }
 0x151   :  { %v234_v30 = vadd.f32 %v233_v29, %v232_v28 }
 0x153   :  { %v235_v31 = vrot.slane %v234_v30, 2 }
 0x155   :  { %v236_v32 = vadd.f32 %v235_v31, %v234_v30 }
 0x157   :  { %v237_v33 = vrot.slane %v236_v32, 1 }
 0x159   :  { %v238_v34 = vadd.f32 %v237_v33, %v236_v32 }
 0x15b   :  { %308 = vpush %v238_v34 }
 0x18c   :  { %s309_s4 = spop %308 }
 0x18d   :  { %v240_v36 = vstv %s309_s4 }
 0x18e   :  { %v241_v37 = vadd.f32 %v240_v36, %v228_v35 }
 0x190   :  { %242 = vst.msk [vmem:[#allocation10] sm:$0x1] %vm118_vm4, %v241_v37 }
 0x191   :  { %429 = shalt.err (!%p426_p8)
}
 0x192   :  { %s430_s14 = scalar_lea.hbm %s595_s7, 16 }
 0x193   :  { %p431_p9 = scmp.ne.s32.totalorder %s595_s7, %s430_s14  ;;  %p434_p10 = scmp.lt.u32.totalorder %s430_s14, %s595_s7 }
 0x195   :  { %p436_p11 = pnand %p434_p10, %p431_p9 }
 0x197   :  { %439 = shalt.err (!%p436_p11)
}
 0x198   :  { %272 = dma.vmem_to_hbm [thread:$0]  %s270_s3, 16, %s595_s7, [#allocation9]  }
 0x199   :  { %444 = dma.done.wait [#allocation4], 16  }
 0x19a   :  { %445 = vsyncadd [#allocation4], 4294967280 }
 0x19b   :  { %446 = dma.done.wait [#allocation9], 32  }
 0x19c   :  { %447 = vsyncadd [#allocation9], 4294967264 }
 0x19d   :  { %282 = vsyncpa [#allocation3], 1 }
 0x19e   :  { %283 = vsyncpa [#allocation6], 1 }
 0x19f   :  { %284 = vsyncpa [#allocation4], 1 }
 0x1a0   :  { %285 = vsyncpa [#allocation9], 1 }

</bundles_post_ra>
